<compile_context>
chip_gen: v7x
topology: tpu7x:2x2x1
jax: 0.10.0
libtpu: 0.0.40
codegen_flags: <defaults>
</compile_context>

<pallas_src>
import functools

import jax
import jax.numpy as jnp
import numpy as np
from jax.experimental import pallas as pl
from jax.experimental.pallas import tpu as pltpu

_NEG_BIG = -1e30  # bias for padded output lanes -> exp() == 0 in the softmax (f32-safe)


def decoder_kernel(x_ref, w_ref, b_ref, o_ref):
    # x_ref: (TB, H)  w_ref: (H, O_pad)  b_ref: (1, O_pad)  o_ref: (TB, O_pad)
    # Fused logits = x @ W + b (MXU matmul, f32 accumulation).
    logits = jnp.dot(x_ref[...], w_ref[...],
                     preferred_element_type=jnp.float32) + b_ref[...]
    # Numerically-stable softmax over the full (lane-padded) output axis, in f32.
    m = jnp.max(logits, axis=-1, keepdims=True)
    e = jnp.exp(logits - m)
    denom = jnp.sum(e, axis=-1, keepdims=True)
    # Exact normalization (divide only touches TB scalars broadcast over lanes).
    o_ref[...] = (e / denom).astype(o_ref.dtype)


def _round_up(n, m):
    return ((n + m - 1) // m) * m


def prepare_decoder_params(w_t, b, *, matmul_dtype=None):
    """One-time parameter prep — do NOT call per forward step.

    w_t: (H, O) float32   nn.Linear weight, pre-transposed so the kernel does x @ W
    b:   (O,)   float32
    Returns (w_padded (H, O_pad), b_padded (1, O_pad)); padded bias lanes get
    -1e30 so exp() underflows to exactly 0 and never perturbs the softmax.
    """
    H, O = w_t.shape
    O_pad = _round_up(O, 128)  # minimal lane padding; don't over-pad (EUP exp cost)
    w_p = jnp.pad(w_t.astype(jnp.float32), ((0, 0), (0, O_pad - O)))
    b_p = jnp.pad(b.astype(jnp.float32), (0, O_pad - O), constant_values=_NEG_BIG)
    b_p = b_p.reshape(1, O_pad)  # bias stays f32 even on the bf16 matmul path
    if matmul_dtype is not None:
        w_p = w_p.astype(matmul_dtype)  # cast once here, never per call
    return w_p, b_p


def _pick_batch_tile(B, block_b):
    if B <= 8:
        return B  # full-array-dim exception; single block, no batch padding
    # Sublane-aligned tile; cap so the parallel batch axis has >= 2 grid steps
    # (keeps both v7x TensorCores fed), target block_b (>=256 fills the MXU M side).
    tb = min(block_b, _round_up(pl.cdiv(B, 2), 8))
    return max(tb, 8)


@functools.partial(jax.jit, static_argnames=("out_features", "block_b", "out_dtype"))
def task1_decoder_forward(x, w_p, b_p, out_features, *, block_b=256,
                          out_dtype=jnp.float32):
    """Fused Linear + Softmax(dim=1) forward.  x: (B, H); params pre-padded."""
    B, H = x.shape
    O_pad = w_p.shape[1]

    # bf16 matmul-input path: weights were pre-cast at init; match x to them.
    if x.dtype != w_p.dtype:
        x = x.astype(w_p.dtype)

    TB = _pick_batch_tile(B, block_b)
    grid = (pl.cdiv(B, TB),)  # partial last block allowed; rows are independent

    # VMEM budget: x / out double-buffered, weight + bias resident (2 pipeline
    # buffers by default).  Clamp to v7x's 64 MiB physical VMEM per TensorCore.
    vmem_bytes = (
        2 * TB * H * x.dtype.itemsize
        + 2 * TB * O_pad * np.dtype(out_dtype).itemsize
        + 2 * H * O_pad * w_p.dtype.itemsize
        + 2 * O_pad * 4
    )
    vmem_limit = int(min(max(2 * vmem_bytes, 8 * 1024 * 1024), 64 * 1024 * 1024))

    out_p = pl.pallas_call(
        decoder_kernel,
        out_shape=jax.ShapeDtypeStruct((B, O_pad), out_dtype),
        grid_spec=pl.GridSpec(
            grid=grid,
            in_specs=[
                pl.BlockSpec((TB, H), lambda i: (i, 0)),      # batch tile
                pl.BlockSpec((H, O_pad), lambda i: (0, 0)),   # weight, resident
                pl.BlockSpec((1, O_pad), lambda i: (0, 0)),   # bias, resident
            ],
            out_specs=pl.BlockSpec((TB, O_pad), lambda i: (i, 0)),
        ),
        compiler_params=pltpu.CompilerParams(
            dimension_semantics=("parallel",),   # batch axis -> both TCs on v7x
            vmem_limit_bytes=vmem_limit,
        ),
    )(x, w_p, b_p)

    # Only the lane padding is sliced off (kept out of the kernel so stores are
    # full-lane, unmasked vst); no batch slice is needed.
    return out_p[:, :out_features]


if __name__ == "__main__":
    key = jax.random.PRNGKey(0)
    k_x, k_w, k_b, k_x2 = jax.random.split(key, 4)

    batch, hidden_size, output_size = 2, 32, 16

    x = jax.random.normal(k_x, (batch, hidden_size), dtype=jnp.float32)
    # Deterministic params (shapes from nn.Linear(hidden_size, output_size));
    # weight kept pre-transposed as (H, O) for a direct x @ W matmul.
    bound = 1.0 / (hidden_size ** 0.5)
    w_t = jax.random.uniform(k_w, (hidden_size, output_size),
                             dtype=jnp.float32, minval=-bound, maxval=bound)
    b = jax.random.uniform(k_b, (output_size,),
                           dtype=jnp.float32, minval=-bound, maxval=bound)

    # One-time parameter prep (lane padding), hoisted out of the hot path.
    w_p, b_p = prepare_decoder_params(w_t, b)

    out = task1_decoder_forward(x, w_p, b_p, out_features=output_size)
    out = jax.block_until_ready(out)

    logits_ref = jnp.dot(x, w_t, precision=jax.lax.Precision.HIGHEST) + b
    ref = jax.nn.softmax(logits_ref, axis=1)
    assert out.shape == (batch, output_size)
    assert jnp.allclose(out, ref, atol=1e-5, rtol=1e-5), "mismatch vs reference"
    assert jnp.allclose(jnp.sum(out, axis=1), 1.0, atol=1e-5), "rows must sum to 1"

    # Exercise the partial-last-block path once (B not a multiple of the batch
    # tile): rows are independent, so clipped tail rows are harmless.
    batch2 = 10
    x2 = jax.random.normal(k_x2, (batch2, hidden_size), dtype=jnp.float32)
    out2 = jax.block_until_ready(
        task1_decoder_forward(x2, w_p, b_p, out_features=output_size))
    ref2 = jax.nn.softmax(
        jnp.dot(x2, w_t, precision=jax.lax.Precision.HIGHEST) + b, axis=1)
    assert out2.shape == (batch2, output_size)
    assert jnp.allclose(out2, ref2, atol=1e-5, rtol=1e-5), "partial-block mismatch"
    assert jnp.allclose(jnp.sum(out2, axis=1), 1.0, atol=1e-5)

    print("KERNEL_OK")
</pallas_src>

<mosaic_0001>
module attributes {stable_mosaic.version = 11 : i64} {
  func.func @decoder_kernel(%arg0: i32, %arg1: memref<2x32xf32, #tpu.memory_space<vmem>>, %arg2: memref<32x128xf32, #tpu.memory_space<vmem>>, %arg3: memref<1x128xf32, #tpu.memory_space<vmem>>, %arg4: memref<2x128xf32, #tpu.memory_space<vmem>>) attributes {dimension_semantics = [#tpu.dimension_semantics<parallel>], iteration_bounds = array<i64: 1>, scalar_prefetch = 0 : i64, scratch_operands = 0 : i64, tpu.core_type = #tpu.core_type<tc>, window_params = [{transform_indices = @transform_0, window_bounds = array<i64: 2, 32>}, {pipeline_mode = #tpu.pipeline_mode<synchronous>, transform_indices = @transform_1, window_bounds = array<i64: 32, 128>}, {pipeline_mode = #tpu.pipeline_mode<synchronous>, transform_indices = @transform_2, window_bounds = array<i64: 1, 128>}, {transform_indices = @transform_3, window_bounds = array<i64: 2, 128>}]} {
    %c0 = arith.constant 0 : index
    %c0_0 = arith.constant 0 : index
    %0 = vector.load %arg1[%c0, %c0_0] : memref<2x32xf32, #tpu.memory_space<vmem>>, vector<2x32xf32>
    %c0_1 = arith.constant 0 : index
    %c0_2 = arith.constant 0 : index
    %1 = vector.load %arg2[%c0_1, %c0_2] : memref<32x128xf32, #tpu.memory_space<vmem>>, vector<32x128xf32>
    %cst = arith.constant dense<0.000000e+00> : vector<2x128xf32>
    %2 = tpu.matmul %0, %1, %cst {dimension_numbers = #tpu.dot_dimension_numbers<[1], [0], [0], [1], [0, 0, 1, 1], [], []>} : vector<2x32xf32>, vector<32x128xf32>, vector<2x128xf32> -> vector<2x128xf32>
    %c0_3 = arith.constant 0 : index
    %c0_4 = arith.constant 0 : index
    %3 = vector.load %arg3[%c0_3, %c0_4] : memref<1x128xf32, #tpu.memory_space<vmem>>, vector<1x128xf32>
    %4 = vector.broadcast %3 : vector<1x128xf32> to vector<2x128xf32>
    %5 = arith.addf %2, %4 : vector<2x128xf32>
    %cst_5 = arith.constant dense<0xFF800000> : vector<2xf32>
    %6 = vector.multi_reduction <maximumf>, %5, %cst_5 [1] : vector<2x128xf32> to vector<2xf32>
    %7 = vector.shape_cast %6 : vector<2xf32> to vector<2x1xf32>
    %8 = vector.broadcast %7 : vector<2x1xf32> to vector<2x128xf32>
    %9 = arith.subf %5, %8 : vector<2x128xf32>
    %10 = math.exp %9 : vector<2x128xf32>
    %cst_6 = arith.constant dense<0.000000e+00> : vector<2xf32>
    %11 = vector.multi_reduction <add>, %10, %cst_6 [1] : vector<2x128xf32> to vector<2xf32>
    %12 = vector.shape_cast %11 : vector<2xf32> to vector<2x1xf32>
    %13 = vector.broadcast %12 : vector<2x1xf32> to vector<2x128xf32>
    %14 = arith.divf %10, %13 : vector<2x128xf32>
    %c0_7 = arith.constant 0 : index
    %c0_8 = arith.constant 0 : index
    %15 = vector.load %arg4[%c0_7, %c0_8] : memref<2x128xf32, #tpu.memory_space<vmem>>, vector<2x128xf32>
    tpu.vector_store %arg4[%c0_7, %c0_8], %14 {strides = array<i32>} : memref<2x128xf32, #tpu.memory_space<vmem>>, vector<2x128xf32>,
    return
  }
  func.func @transform_0(%arg0: i32) -> (i32, i32) {
    %c0_i32 = arith.constant 0 : i32
    %c0_i32_0 = arith.constant 0 : i32
    return %arg0, %c0_i32 : i32, i32
  }
  func.func @transform_1(%arg0: i32) -> (i32, i32) {
    %c0_i32 = arith.constant 0 : i32
    %c0_i32_0 = arith.constant 0 : i32
    %c0_i32_1 = arith.constant 0 : i32
    return %c0_i32, %c0_i32_0 : i32, i32
  }
  func.func @transform_2(%arg0: i32) -> (i32, i32) {
    %c0_i32 = arith.constant 0 : i32
    %c0_i32_0 = arith.constant 0 : i32
    %c0_i32_1 = arith.constant 0 : i32
    return %c0_i32, %c0_i32_0 : i32, i32
  }
  func.func @transform_3(%arg0: i32) -> (i32, i32) {
    %c0_i32 = arith.constant 0 : i32
    %c0_i32_0 = arith.constant 0 : i32
    return %arg0, %c0_i32 : i32, i32
  }
}

</mosaic_0001>

<bundles_post_ra>
// kernel: task1_decoder_forward.1
= control target key start
LH: loop header
LB: loop body
LE: loop exit
PB: predicated region body
PF: predicated region fallthrough
CT: control target
= control target key end

     0   :  { %8 = vsyncpa [#allocation3], 0  ;;  %s338_s0 = inlined_call_operand.hbm [shape: f32[2,32], index: 0, kind: input, shape index: {}]   ;;  %s339_s1 = inlined_call_operand.hbm [shape: f32[32,128], index: 1, kind: input, shape index: {}]   ;;  %s340_s2 = inlined_call_operand.vmem [shape: f32[1,128], index: 2, kind: input, shape index: {}]   ;;  %s341_s3 = inlined_call_operand.hbm [shape: f32[2,128], index: 3, kind: output, shape index: {}]  }
   0x1   :  { %9 = vsyncpa [#allocation6], 0 }
   0x2   :  { %10 = vsyncpa [#allocation4], 0  ;;  %s264_s12 = smov [#allocation2]   ;;  %s265_s14 = smov [#allocation5]  }
   0x3   :  { %s17_s13 = sshll.u32 %s264_s12, 4  ;;  %s26_s15 = sshll.u32 %s265_s14, 4  ;;  %s18_s13 = int_to_ptr.vmem [resolvable:$true] %s17_s13  ;;  %s292_s15 = int_to_ptr.vmem [resolvable:$true] %s26_s15 }
   0x4   :  { %s192_s18 = scalar_lea.hbm %s338_s0, 32 }
   0x5   :  { %p193_p0 = scmp.ne.s32.totalorder %s338_s0, %s192_s18  ;;  %p196_p1 = scmp.lt.u32.totalorder %s192_s18, %s338_s0 }
   0x7   :  { %p198_p2 = pnand %p196_p1, %p193_p0 }
   0x9   :  { %201 = shalt.err (!%p198_p2)
}
   0xa   :  { %s202_s23 = scalar_lea.vmem %s18_s13, 32  ;;  %p207_p4 = scmp.lt.s32.totalorder %s18_s13, %s18_s13 }
   0xb   :  { %p203_p3 = scmp.ne.s32.totalorder %s18_s13, %s202_s23  ;;  %p208_p5 = scmp.lt.s32.totalorder %s202_s23, %s202_s23 }
   0xd   :  { %p209_p6 = por %p208_p5, %p207_p4 }
   0xf   :  { %p210_p7 = pnand %p209_p6, %p203_p3 }
  0x11   :  { %213 = shalt.err (!%p210_p7)
}
  0x12   :  { %20 = dma.hbm_to_vmem [thread:$0]  %s338_s0, 32, %s18_s13, [#allocation3]  }
  0x13   :  { %s214_s28 = scalar_lea.hbm %s339_s1, 512 }
  0x14   :  { %p215_p8 = scmp.ne.s32.totalorder %s339_s1, %s214_s28  ;;  %p218_p9 = scmp.lt.u32.totalorder %s214_s28, %s339_s1 }
  0x16   :  { %p220_p10 = pnand %p218_p9, %p215_p8 }
  0x18   :  { %223 = shalt.err (!%p220_p10)
}
  0x19   :  { %s224_s6 = scalar_lea.vmem %s292_s15, 512  ;;  %p229_p12 = scmp.lt.s32.totalorder %s292_s15, %s292_s15 }
  0x1a   :  { %p225_p11 = scmp.ne.s32.totalorder %s292_s15, %s224_s6  ;;  %p230_p13 = scmp.lt.s32.totalorder %s224_s6, %s224_s6 }
  0x1c   :  { %p231_p0 = por %p230_p13, %p229_p12 }
  0x1e   :  { %p232_p1 = pnand %p231_p0, %p225_p11 }
  0x20   :  { %235 = shalt.err (!%p232_p1)
}
  0x21   :  { %s266_s0 = smov 128   ;;  %s267_s7 = smov 8  }
  0x22   :  { %32 = dma.hbm_to_vmem [thread:$0]  %s339_s1, 512, %s292_s15, [#allocation6], %s266_s0, %s266_s0, %s267_s7  }
  0x23   :  { %258 = dma.done.wait [#allocation3], 32  }
  0x24   :  { %259 = vsyncadd [#allocation3], 4294967264 }
  0x25   :  { %260 = dma.done.wait [#allocation6], 512  }
  0x26   :  { %261 = vsyncadd [#allocation6], 4294966784  ;;  %v268_v0 = vmov 0.0|0.0   ;;  %vm269_vm0 = vmmov 0   ;;  %v270_v1 = vmov 0.0   ;;  %v42_v2 = vld [vmem:[#allocation5] sm:$0xff] }
  0x27   :  { %174 = vmatprep.subr.bf16.mxu0 %v268_v0  ;;  %171 = vmatprep.mubr.msk.f32.mxu0 %vm269_vm0, %v270_v1  ;;  %v43_v3 = vld [vmem:[#allocation5 + $0x8] sm:$0xff]  ;;  %v44_v4 = vld [vmem:[#allocation5 + $0x10] sm:$0xff]  ;;  %v45_v6 = vld [vmem:[#allocation5 + $0x18] sm:$0xff]  ;;  %vm53_vm1 = vcmask 261120   ;;  %vm127_vm2 = vcmask 1041408   ;;  %s271_s11 = smov [#allocation7]  }
  0x28   :  { %v175_v5 = vpack.c.bf16 %v43_v3, %v42_v2  ;;  %v178_v7 = vpack.c.bf16 %v45_v6, %v44_v4  ;;  %v41_v8 = vld [vmem:[#allocation2] sm:$0x3]  ;;  %s146_s12 = sshll.u32 %s271_s11, 4  ;;  %s147_s12 = int_to_ptr.vmem [resolvable:$true] %s146_s12 }
  0x29   :  { %v156_v9 = vld [vmem:[%s340_s2] ss:$0 sm:$0xff]  ;;  %s236_s2 = scalar_lea.vmem %s147_s12, 32  ;;  %p241_p3 = scmp.lt.s32.totalorder %s147_s12, %s147_s12 }
  0x2a   :  { %176 = vmatpush3.bf16.msra.mxu0 %v175_v5  ;;  %p237_p2 = scmp.ne.s32.totalorder %s147_s12, %s236_s2  ;;  %p242_p4 = scmp.lt.s32.totalorder %s236_s2, %s236_s2 }
  0x2b   :  { %177 = vmatprep.subr.bf16.mxu0 %v268_v0 }
  0x2c   :  { %p243_p5 = por %p242_p4, %p241_p3 }
  0x2e   :  { %179 = vmatpush3.bf16.msra.mxu0 %v178_v7  ;;  %p244_p6 = pnand %p243_p5, %p237_p2 }
  0x31   :  { %172 = vmatmul.mubr.msk.f32.vlgmr.msra.gmra.mrb[0].mxu0 %vm53_vm1, %v41_v8 }
 0x104   :  { %v123_v10 = vpop.f32.mrb[0].mxu0 }
 0x105   :  { %v124_v11 = vadd.f32 %v156_v9, %v123_v10  ;;  %v173_v12 = vpop.f32.mrb[1].mxu0 }
 0x107   :  { %v128_v13 = vsel %vm127_vm2, %v124_v11, -inf }
 0x108   :  { %129 = vmax.xlane.f32.xlu0 %v128_v13 }
 0x195   :  { %v130_v14 = vpop.xlane.xlu0 %129 }
 0x196   :  { %v131_v15 = vsub.f32 %v124_v11, %v130_v14 }
 0x198   :  { %v132_v16 = vmul.f32 1.442695, %v131_v15 }
 0x19a   :  { %188 = vpow2.f32 %v132_v16 }
 0x1a4   :  { %v189_v17 = vpop.eup %188 }
 0x1a5   :  { %v134_v18 = vsel %vm127_vm2, %v189_v17, 0.0 }
 0x1a6   :  { %135 = vadd.xlane.f32.xlu0 %v134_v18 }
 0x233   :  { %v136_v19 = vpop.xlane.xlu0 %135 }
 0x234   :  { %190 = vrcp.f32 %v136_v19 }
 0x23e   :  { %v191_v20 = vpop.eup %190 }
 0x23f   :  { %v138_v21 = vmul.f32 %v191_v20, %v189_v17 }
 0x241   :  { %139 = vst [vmem:[#allocation7] sm:$0x3] %v138_v21 }
 0x242   :  { %247 = shalt.err (!%p244_p6)
}
 0x243   :  { %s248_s15 = scalar_lea.hbm %s341_s3, 32 }
 0x244   :  { %p249_p7 = scmp.ne.s32.totalorder %s341_s3, %s248_s15  ;;  %p252_p8 = scmp.lt.u32.totalorder %s248_s15, %s341_s3 }
 0x246   :  { %p254_p9 = pnand %p252_p8, %p249_p7 }
 0x248   :  { %257 = shalt.err (!%p254_p9)
}
 0x249   :  { %149 = dma.vmem_to_hbm [thread:$0]  %s147_s12, 32, %s341_s3, [#allocation4]  }
 0x24a   :  { %262 = dma.done.wait [#allocation4], 32  }
 0x24b   :  { %263 = vsyncadd [#allocation4], 4294967264 }
 0x24c   :  { %153 = vsyncpa [#allocation3], 1 }
 0x24d   :  { %154 = vsyncpa [#allocation6], 1 }
 0x24e   :  { %155 = vsyncpa [#allocation4], 1 }

</bundles_post_ra>
